<compile_context>
chip_gen: v6e
topology: v6e:2x2x1
jax: 0.10.0
libtpu: 0.0.40
codegen_flags: <defaults>
</compile_context>

<pallas_src>
import functools
import math

import jax
import jax.numpy as jnp
from jax.experimental import pallas as pl
from jax.experimental.pallas import tpu as pltpu


def _arcsoftmax_kernel(x_ref, wn_ref, o_ref, *, s, m):
    x = x_ref[...]        # (TM, F) f32
    w_n = wn_ref[...]     # (F, C)  f32, pre-normalized column-wise in the wrapper

    # F.normalize(x, dim=1): x * rsqrt(max(||x||^2, eps^2)), eps = 1e-12.
    # rsqrt runs in the EUP slot (co-issues with VALU work) instead of a divide.
    sumsq = jnp.sum(x * x, axis=1, keepdims=True)
    x_n = x * jax.lax.rsqrt(jnp.maximum(sumsq, 1e-24))

    # d = x_n @ w_n on the MXU.  cosa == d / 10; the /10 and the *10 inside the
    # exponents cancel, so we work directly with d.
    d = jnp.dot(x_n, w_n, preferred_element_type=jnp.float32)

    # exp(s * cosa * 10) == exp(s * d)
    e_cosa = jnp.exp(jnp.float32(s) * d)
    row_sum = jnp.sum(e_cosa, axis=1, keepdims=True)

    # a = acos(d/10);  s * cos(a + m) * 10 = s*cos(m)*d - s*sin(m)*sqrt(100 - d^2)
    # (a in [0, pi] so sin(a) >= 0; the sqrt argument is clamped at 0).
    sc = jnp.float32(s * math.cos(m))
    ss = jnp.float32(s * math.sin(m))
    t = jnp.sqrt(jnp.maximum(100.0 - d * d, 0.0))
    e_margin = jnp.exp(sc * d - ss * t)

    o_ref[...] = (e_margin / (row_sum - e_cosa + e_margin)).astype(o_ref.dtype)


def _pick_tm(n, f, c, budget_bytes=16 * 1024 * 1024):
    """Batch-tile rows that keep the per-step live set inside a VMEM budget."""
    # Per batch row (f32): x double-buffer (2F) + out double-buffer (2C)
    # + ~4 in-kernel (TM, C) temporaries.
    per_row = 4 * (2 * f + 6 * c)
    tm = budget_bytes // max(per_row, 1)
    tm = max(8, min(512, (tm // 8) * 8))   # f32 sublane multiple of 8
    if n <= tm:
        return n                            # block == full dim is always legal
    return tm


def arcsoftmax(x, w, s=1.0, m=0.2, *, tm=None):
    """x: (N, feature_num) f32, w: (feature_num, cls_num) f32 -> (N, cls_num) f32."""
    n, f = x.shape
    f2, c = w.shape
    assert f == f2

    # Hoist F.normalize(W, dim=0) out of the grid loop: one tiny XLA op on (F, C)
    # instead of an XLU reduction + divide on every batch tile.
    w_n = w / jnp.maximum(jnp.sqrt(jnp.sum(w * w, axis=0, keepdims=True)), 1e-12)

    if tm is None:
        tm = _pick_tm(n, f, c)
    grid_m = pl.cdiv(n, tm)

    # Explicit VMEM budget: x/out double-buffers + resident W + ~4 (TM, C) temps,
    # with 2x headroom, capped at 48 MiB so it fits v7x's 64 MiB VMEM comfortably.
    est_vmem = 4 * (2 * tm * f + 2 * f * c + 2 * tm * c + 4 * tm * c)
    vmem_limit = int(min(max(2 * est_vmem, 32 * 1024 * 1024), 48 * 1024 * 1024))

    kernel = functools.partial(_arcsoftmax_kernel, s=float(s), m=float(m))
    return pl.pallas_call(
        kernel,
        out_shape=jax.ShapeDtypeStruct((n, c), jnp.float32),
        grid=(grid_m,),
        in_specs=[
            pl.BlockSpec((tm, f), lambda i: (i, 0)),   # batch tile of x
            pl.BlockSpec((f, c), lambda i: (0, 0)),    # W resident across the grid
        ],
        out_specs=pl.BlockSpec((tm, c), lambda i: (i, 0)),
        compiler_params=pltpu.CompilerParams(
            dimension_semantics=("parallel",),          # megacore sharding on v7x
            vmem_limit_bytes=vmem_limit,
        ),
    )(x, w_n)


def arcsoftmax_ref(x, w, s=1.0, m=0.2):
    """Pure-JAX reference mirroring the PyTorch forward."""
    x_n = x / jnp.maximum(jnp.linalg.norm(x, axis=1, keepdims=True), 1e-12)
    w_n = w / jnp.maximum(jnp.linalg.norm(w, axis=0, keepdims=True), 1e-12)
    cosa = (x_n @ w_n) / 10.0
    a = jnp.arccos(cosa)
    num = jnp.exp(s * jnp.cos(a + m) * 10.0)
    e_cosa = jnp.exp(s * cosa * 10.0)
    return num / (jnp.sum(e_cosa, axis=1, keepdims=True) - e_cosa + num)


if __name__ == "__main__":
    key = jax.random.PRNGKey(0)
    kx, kw = jax.random.split(key)

    # Small, TPU-tile-friendly demo shapes (batch=8, feature=32, classes=128).
    N, FEATURE_NUM, CLS_NUM = 8, 32, 128
    x = jax.random.normal(kx, (N, FEATURE_NUM), dtype=jnp.float32)
    W = jax.random.normal(kw, (FEATURE_NUM, CLS_NUM), dtype=jnp.float32)

    out = arcsoftmax(x, W, s=1.0, m=0.2)
    out = jax.block_until_ready(out)
    ref = arcsoftmax_ref(x, W, s=1.0, m=0.2)
    assert out.shape == (N, CLS_NUM)
    assert jnp.allclose(out, ref, atol=1e-5, rtol=1e-5), "mismatch vs reference"

    # Also exercise the multi-step batch grid (4 tiles of 8 rows) to validate the
    # pipelined/tiled path and the resident-W BlockSpec.
    N2 = 32
    x2 = jax.random.normal(jax.random.PRNGKey(1), (N2, FEATURE_NUM), dtype=jnp.float32)
    out2 = jax.block_until_ready(arcsoftmax(x2, W, s=1.0, m=0.2, tm=8))
    ref2 = arcsoftmax_ref(x2, W, s=1.0, m=0.2)
    assert jnp.allclose(out2, ref2, atol=1e-5, rtol=1e-5), "mismatch vs reference (gridded)"

    print("KERNEL_OK")
</pallas_src>

<mosaic_0001>
module attributes {stable_mosaic.version = 11 : i64} {
  func.func @_arcsoftmax_kernel(%arg0: i32, %arg1: memref<8x32xf32, #tpu.memory_space<vmem>>, %arg2: memref<32x128xf32, #tpu.memory_space<vmem>>, %arg3: memref<8x128xf32, #tpu.memory_space<vmem>>) attributes {dimension_semantics = [#tpu.dimension_semantics<parallel>], iteration_bounds = array<i64: 1>, scalar_prefetch = 0 : i64, scratch_operands = 0 : i64, tpu.core_type = #tpu.core_type<tc>, window_params = [{transform_indices = @transform_0, window_bounds = array<i64: 8, 32>}, {pipeline_mode = #tpu.pipeline_mode<synchronous>, transform_indices = @transform_1, window_bounds = array<i64: 32, 128>}, {transform_indices = @transform_2, window_bounds = array<i64: 8, 128>}]} {
    %c0 = arith.constant 0 : index
    %c0_0 = arith.constant 0 : index
    %0 = vector.load %arg1[%c0, %c0_0] : memref<8x32xf32, #tpu.memory_space<vmem>>, vector<8x32xf32>
    %c0_1 = arith.constant 0 : index
    %c0_2 = arith.constant 0 : index
    %1 = vector.load %arg2[%c0_1, %c0_2] : memref<32x128xf32, #tpu.memory_space<vmem>>, vector<32x128xf32>
    %2 = arith.mulf %0, %0 : vector<8x32xf32>
    %cst = arith.constant dense<0.000000e+00> : vector<8xf32>
    %3 = vector.multi_reduction <add>, %2, %cst [1] : vector<8x32xf32> to vector<8xf32>
    %4 = vector.shape_cast %3 : vector<8xf32> to vector<8x1xf32>
    %cst_3 = arith.constant 1.000000e-24 : f32
    %5 = vector.broadcast %cst_3 : f32 to vector<8x1xf32>
    %6 = arith.maximumf %4, %5 : vector<8x1xf32>
    %7 = math.rsqrt %6 : vector<8x1xf32>
    %8 = vector.broadcast %7 : vector<8x1xf32> to vector<8x32xf32>
    %9 = arith.mulf %0, %8 : vector<8x32xf32>
    %cst_4 = arith.constant dense<0.000000e+00> : vector<8x128xf32>
    %10 = tpu.matmul %9, %1, %cst_4 {dimension_numbers = #tpu.dot_dimension_numbers<[1], [0], [0], [1], [0, 0, 1, 1], [], []>} : vector<8x32xf32>, vector<32x128xf32>, vector<8x128xf32> -> vector<8x128xf32>
    %cst_5 = arith.constant 1.000000e+00 : f32
    %11 = vector.broadcast %cst_5 : f32 to vector<8x128xf32>
    %12 = arith.mulf %11, %10 : vector<8x128xf32>
    %13 = math.exp %12 : vector<8x128xf32>
    %cst_6 = arith.constant dense<0.000000e+00> : vector<8xf32>
    %14 = vector.multi_reduction <add>, %13, %cst_6 [1] : vector<8x128xf32> to vector<8xf32>
    %15 = vector.shape_cast %14 : vector<8xf32> to vector<8x1xf32>
    %16 = arith.mulf %10, %10 : vector<8x128xf32>
    %cst_7 = arith.constant 1.000000e+02 : f32
    %17 = vector.broadcast %cst_7 : f32 to vector<8x128xf32>
    %18 = arith.subf %17, %16 : vector<8x128xf32>
    %cst_8 = arith.constant 0.000000e+00 : f32
    %19 = vector.broadcast %cst_8 : f32 to vector<8x128xf32>
    %20 = arith.maximumf %18, %19 : vector<8x128xf32>
    %21 = math.sqrt %20 : vector<8x128xf32>
    %cst_9 = arith.constant 0.980066597 : f32
    %22 = vector.broadcast %cst_9 : f32 to vector<8x128xf32>
    %23 = arith.mulf %22, %10 : vector<8x128xf32>
    %cst_10 = arith.constant 0.198669329 : f32
    %24 = vector.broadcast %cst_10 : f32 to vector<8x128xf32>
    %25 = arith.mulf %24, %21 : vector<8x128xf32>
    %26 = arith.subf %23, %25 : vector<8x128xf32>
    %27 = math.exp %26 : vector<8x128xf32>
    %28 = vector.broadcast %15 : vector<8x1xf32> to vector<8x128xf32>
    %29 = arith.subf %28, %13 : vector<8x128xf32>
    %30 = arith.addf %29, %27 : vector<8x128xf32>
    %31 = arith.divf %27, %30 : vector<8x128xf32>
    %c0_11 = arith.constant 0 : index
    %c0_12 = arith.constant 0 : index
    %32 = vector.load %arg3[%c0_11, %c0_12] : memref<8x128xf32, #tpu.memory_space<vmem>>, vector<8x128xf32>
    tpu.vector_store %arg3[%c0_11, %c0_12], %31 {strides = array<i32>} : memref<8x128xf32, #tpu.memory_space<vmem>>, vector<8x128xf32>,
    return
  }
  func.func @transform_0(%arg0: i32) -> (i32, i32) {
    %c0_i32 = arith.constant 0 : i32
    %c0_i32_0 = arith.constant 0 : i32
    return %arg0, %c0_i32 : i32, i32
  }
  func.func @transform_1(%arg0: i32) -> (i32, i32) {
    %c0_i32 = arith.constant 0 : i32
    %c0_i32_0 = arith.constant 0 : i32
    %c0_i32_1 = arith.constant 0 : i32
    return %c0_i32, %c0_i32_0 : i32, i32
  }
  func.func @transform_2(%arg0: i32) -> (i32, i32) {
    %c0_i32 = arith.constant 0 : i32
    %c0_i32_0 = arith.constant 0 : i32
    return %arg0, %c0_i32 : i32, i32
  }
}

</mosaic_0001>

<bundles_post_ra>
// kernel: tpu_custom_call.1
= control target key start
LH: loop header
LB: loop body
LE: loop exit
PB: predicated region body
PF: predicated region fallthrough
CT: control target
= control target key end

     0   :  { %7 = vsyncpa [#allocation3], 0  ;;  %s297_s0 = inlined_call_operand.hbm [shape: f32[8,32], index: 0, kind: input, shape index: {}]   ;;  %s298_s1 = inlined_call_operand.hbm [shape: f32[32,128], index: 1, kind: input, shape index: {}]   ;;  %s299_s2 = inlined_call_operand.hbm [shape: f32[8,128], index: 2, kind: output, shape index: {}]  }
   0x1   :  { %8 = vsyncpa [#allocation6], 0 }
   0x2   :  { %9 = vsyncpa [#allocation4], 0  ;;  %s264_s9 = smov [#allocation2]   ;;  %s265_s11 = smov [#allocation5]  }
   0x3   :  { %s16_s10 = sshll.u32 %s264_s9, 4  ;;  %s25_s12 = sshll.u32 %s265_s11, 4  ;;  %s17_s10 = int_to_ptr.vmem [resolvable:$true] %s16_s10  ;;  %s26_s12 = int_to_ptr.vmem [resolvable:$true] %s25_s12 }
   0x4   :  { %s206_s13 = scalar_lea.vmem %s17_s10, 128  ;;  %p211_p1 = scmp.lt.s32.totalorder %s17_s10, %s17_s10 }
   0x5   :  { %p207_p0 = scmp.ne.s32.totalorder %s17_s10, %s206_s13  ;;  %p212_p2 = scmp.lt.s32.totalorder %s206_s13, %s206_s13 }
   0x7   :  { %p213_p3 = por %p212_p2, %p211_p1 }
   0x9   :  { %p214_p4 = pnand %p213_p3, %p207_p0 }
   0xb   :  { %217 = shalt.err (!%p214_p4)
}
   0xc   :  { %19 = dma.hbm_to_vmem [thread:$0]  %s297_s0, 128, %s17_s10, [#allocation3]  }
   0xd   :  { %s226_s16 = scalar_lea.vmem %s26_s12, 512  ;;  %p231_p6 = scmp.lt.s32.totalorder %s26_s12, %s26_s12 }
   0xe   :  { %p227_p5 = scmp.ne.s32.totalorder %s26_s12, %s226_s16  ;;  %p232_p7 = scmp.lt.s32.totalorder %s226_s16, %s226_s16 }
  0x10   :  { %p233_p8 = por %p232_p7, %p231_p6 }
  0x12   :  { %p234_p9 = pnand %p233_p8, %p227_p5 }
  0x14   :  { %237 = shalt.err (!%p234_p9)
}
  0x15   :  { %s266_s17 = smov 128   ;;  %s267_s18 = smov 8  }
  0x16   :  { %31 = dma.hbm_to_vmem [thread:$0]  %s298_s1, 512, %s26_s12, [#allocation6], %s266_s17, %s266_s17, %s267_s18  }
  0x17   :  { %258 = dma.done.wait [#allocation3], 128  }
  0x18   :  { %259 = vsyncadd [#allocation3], 4294967168 }
  0x19   :  { %260 = dma.done.wait [#allocation6], 512  }
  0x1a   :  { %261 = vsyncadd [#allocation6], 4294966784  ;;  %v38_v0 = vld [vmem:[#allocation2] sm:$0xff]  ;;  %vm44_vm0 = vcmask 261120   ;;  %v268_v4 = vmov 0.0   ;;  %v41_v5 = vld [vmem:[#allocation5 + $0x10] sm:$0xff] }
  0x1b   :  { %v43_v1 = vmul.f32 %v38_v0, %v38_v0  ;;  %v42_v3 = vld [vmem:[#allocation5 + $0x18] sm:$0xff]  ;;  %170 = vmatprep.subr.mxu0 %v268_v4  ;;  %vm269_vm1 = vmmov 0   ;;  %v40_v6 = vld [vmem:[#allocation5 + $0x8] sm:$0xff]  ;;  %v39_v7 = vld [vmem:[#allocation5] sm:$0xff]  ;;  %s270_s0 = smov [#allocation7]  }
  0x1c   :  { %178 = vmatprep.mubr.msk.f32.mxu0 %vm269_vm1, %v268_v4  ;;  %171 = vmatpush3.msra.mxu0 %v42_v3  ;;  %s154_s1 = sshll.u32 %s270_s0, 4  ;;  %s155_s1 = int_to_ptr.vmem [resolvable:$true] %s154_s1 }
  0x1d   :  { %v45_v2 = vsel %vm44_vm0, %v43_v1, 0.0  ;;  %172 = vmatprep.subr.mxu0 %v268_v4  ;;  %s238_s21 = scalar_lea.vmem %s155_s1, 128  ;;  %p243_p11 = scmp.lt.s32.totalorder %s155_s1, %s155_s1 }
  0x1e   :  { %46 = vadd.xlane.f32.xlu0 %v45_v2  ;;  %173 = vmatpush3.msra.mxu0 %v41_v5  ;;  %p239_p10 = scmp.ne.s32.totalorder %s155_s1, %s238_s21  ;;  %p244_p12 = scmp.lt.s32.totalorder %s238_s21, %s238_s21 }
  0x1f   :  { %174 = vmatprep.subr.mxu0 %v268_v4 }
  0x20   :  { %175 = vmatpush3.msra.mxu0 %v40_v6  ;;  %p245_p13 = por %p244_p12, %p243_p11 }
  0x21   :  { %176 = vmatprep.subr.mxu0 %v268_v4 }
  0x22   :  { %177 = vmatpush3.msra.mxu0 %v39_v7  ;;  %p246_p0 = pnand %p245_p13, %p239_p10 }
  0xa7   :  { %v47_v8 = vpop.xlane.xlu0 %46 }
  0xa8   :  { %v48_v9 = vmax.f32 %v47_v8, 1e-24 }
  0xaa   :  { %188 = vrsqrt.f32 %v48_v9 }
  0xb7   :  { %v189_v10 = vpop.eup %188 }
  0xb8   :  { %v50_v11 = vmul.f32 %v189_v10, %v38_v0 }
  0xba   :  { %179 = vmatmul.mubr.msk.f32.vlgmr.msra.gmra.mxu0 %vm44_vm0, %v50_v11 }
 0x17a   :  { %v120_v12 = vpop.f32.mrf.mxu0 }
 0x17b   :  { %v124_v13 = vmul.f32 1.442695, %v120_v12  ;;  %v128_v16 = vmul.f32 %v120_v12, %v120_v12  ;;  %v138_v25 = vmul.f32 0.9800666, %v120_v12 }
 0x17c   :  { %v180_v14 = vpop.f32.mrf.mxu0 }
 0x17d   :  { %190 = vpow2.f32 %v124_v13  ;;  %v129_v17 = vsub.f32 100.0, %v128_v16 }
 0x17f   :  { %v130_v18 = vmax.f32 %v129_v17, 0.0 }
 0x181   :  { %192 = vrsqrt.f32 %v130_v18  ;;  %vm133_vm2 = vcmp.eq.f32.partialorder %v130_v18, inf  ;;  %v136_v22 = vand.u32 2147483648, %v130_v18  ;;  %vm135_vm3 = vcmp.eq.f32.partialorder %v130_v18, 0.0 }
 0x18a   :  { %v191_v15 = vpop.eup %190 }
 0x18b   :  { %126 = vadd.xlane.f32.xlu0 %v191_v15 }
 0x18e   :  { %v193_v19 = vpop.eup %192 }
 0x18f   :  { %v132_v20 = vmul.f32 %v193_v19, %v130_v18 }
 0x191   :  { %v134_v21 = vsel %vm133_vm2, %v130_v18, %v132_v20 }
 0x192   :  { %v137_v23 = vsel %vm135_vm3, %v136_v22, %v134_v21 }
 0x193   :  { %v139_v24 = vmul.f32 0.19866933, %v137_v23 }
 0x195   :  { %v140_v26 = vsub.f32 %v138_v25, %v139_v24 }
 0x197   :  { %v141_v27 = vmul.f32 1.442695, %v140_v26 }
 0x199   :  { %194 = vpow2.f32 %v141_v27 }
 0x1a6   :  { %v195_v30 = vpop.eup %194 }
 0x214   :  { %v127_v28 = vpop.xlane.xlu0 %126 }
 0x215   :  { %v143_v29 = vsub.f32 %v127_v28, %v191_v15 }
 0x217   :  { %v144_v31 = vadd.f32 %v195_v30, %v143_v29 }
 0x219   :  { %196 = vrcp.f32 %v144_v31 }
 0x226   :  { %v197_v32 = vpop.eup %196 }
 0x227   :  { %v146_v33 = vmul.f32 %v197_v32, %v195_v30 }
 0x229   :  { %147 = vst [vmem:[#allocation7] sm:$0xff] %v146_v33 }
 0x22a   :  { %249 = shalt.err (!%p246_p0)
}
 0x22b   :  { %157 = dma.vmem_to_hbm [thread:$0]  %s155_s1, 128, %s299_s2, [#allocation4]  }
 0x22c   :  { %262 = dma.done.wait [#allocation4], 128  }
 0x22d   :  { %263 = vsyncadd [#allocation4], 4294967168 }
 0x22e   :  { %161 = vsyncpa [#allocation3], 1 }
 0x22f   :  { %162 = vsyncpa [#allocation6], 1 }
 0x230   :  { %163 = vsyncpa [#allocation4], 1 }

</bundles_post_ra>
